<compile_context>
chip_gen: v6e
topology: v6e:2x2x1
jax: 0.10.0
libtpu: 0.0.40
codegen_flags: <defaults>
</compile_context>

<pallas_src>
import functools

import jax
import jax.numpy as jnp
from jax.experimental import pallas as pl
from jax.experimental.pallas import tpu as pltpu


# --------------------------------------------------------------------------
# Generation-aware VMEM sizing
# --------------------------------------------------------------------------
def _tpu_vmem_capacity_bytes() -> int:
    """Physical VMEM per TensorCore (128 MiB v5e/v6e, 64 MiB v7x)."""
    try:
        cap = getattr(pltpu.get_tpu_info(), "vmem_capacity_bytes", None)
        if cap:
            return int(cap)
    except Exception:
        pass
    return 128 * 1024 * 1024


def _vmem_limit_bytes(block_bytes: int, cap: int) -> int:
    """Scoped-VMEM limit: ~1.5x the actual block footprint (>= 32 MiB), capped
    at ~90% of physical VMEM to leave headroom for Mosaic scratch."""
    want = max(32 * 1024 * 1024, (block_bytes * 3) // 2)
    return int(min((cap * 9) // 10, want))


# --------------------------------------------------------------------------
# Fused single-pass kernel: stats + pass-through copy + stat-channel concat
# --------------------------------------------------------------------------
def _fused_kernel(x_ref, o_ref, *, G, TM, F, cHW, CHW, HW):
    # x_ref: (G, TM, CHW)   o_ref: (G, TM, CHW + F*HW)
    xf = x_ref[...].astype(jnp.float32)                     # (G, TM, CHW)
    mu = jnp.mean(xf, axis=0)                               # (TM, CHW)  (VPU adds over G)
    var = jnp.mean((xf - mu) ** 2, axis=0)                  # (TM, CHW)
    sd = jnp.sqrt(var + 1e-8)                               # (TM, CHW)  (EUP)

    # Pass-through copy: one big lane-dense store starting at lane 0.
    o_ref[:, :, :CHW] = x_ref[...].astype(o_ref.dtype)

    # Per-member statistic for each appended channel f, then build the whole
    # (TM, F*HW) tail and store it with a single contiguous store.
    tail_parts = []
    for f in range(F):                                      # F is tiny and static
        stat_f = jnp.mean(sd[:, f * cHW:(f + 1) * cHW], axis=-1, keepdims=True)  # (TM, 1)
        tail_parts.append(jnp.broadcast_to(stat_f, (TM, HW)))
    tail = jnp.concatenate(tail_parts, axis=-1)             # (TM, F*HW)
    o_ref[:, :, CHW:] = jnp.broadcast_to(tail[None], (G, TM, F * HW)).astype(o_ref.dtype)


def _pick_member_tile(M, G, CHW, out_cols, itemsize, budget):
    """Member tile TM for the fused path: divides M, and is a multiple of 8 or
    equal to M (the (8,128) rule on the second-to-last block dim).  Returns
    None if no valid tile fits the (double-buffered) VMEM budget."""
    valid = [tm for tm in range(1, M + 1)
             if M % tm == 0 and (tm % 8 == 0 or tm == M)]
    fitting = [tm for tm in valid
               if 2 * G * tm * (CHW + out_cols) * itemsize <= budget]
    if not fitting:
        return None
    # Prefer the smallest tile that still moves >= ~1 MiB per grid step: keeps
    # the DMA pipeline and the v7x megacore split busy without paying the
    # ~0.35 us per-step overhead on tiny blocks.
    for tm in sorted(fitting):
        if G * tm * (CHW + out_cols) * itemsize >= (1 << 20):
            return tm
    return max(fitting)


# --------------------------------------------------------------------------
# Fallback pass 1: per-(m, f) std-dev statistic, f32, shape (M, F)
# --------------------------------------------------------------------------
def _stat_tile_kernel(x_ref, stat_ref, *, F, cHW):
    # x_ref: (G, CHW) tile for group member m = program_id(0)
    m = pl.program_id(0)
    xf = x_ref[...].astype(jnp.float32)
    mu = jnp.mean(xf, axis=0, keepdims=True)                 # (1, CHW)
    var = jnp.mean((xf - mu) ** 2, axis=0, keepdims=True)    # (1, CHW)
    sd = jnp.sqrt(var + 1e-8)                                # (1, CHW)
    row = jnp.mean(sd.reshape(F, cHW), axis=-1).reshape(1, F)
    stat_ref[pl.ds(m, 1), :] = row                           # resident (M, F) output


def _stat_full_kernel(x_ref, stat_ref, *, M, F, cHW):
    # TODO(synk): column-tiled stat accumulation for non-128-aligned C*H*W at
    # very large sizes; this single-block version is only reached when the
    # fused path cannot fit in VMEM *and* C*H*W is not lane-aligned.
    xf = x_ref[...].astype(jnp.float32)                      # (G, M*CHW)
    mu = jnp.mean(xf, axis=0, keepdims=True)
    var = jnp.mean((xf - mu) ** 2, axis=0, keepdims=True)
    sd = jnp.sqrt(var + 1e-8)                                # (1, M*CHW)
    stat_ref[...] = jnp.mean(sd.reshape(M * F, cHW), axis=-1).reshape(M, F)


# --------------------------------------------------------------------------
# Fallback pass 2: lane-dense pass-through copy + single-store stat tail
# --------------------------------------------------------------------------
def _copy_concat_kernel(stat_ref, x_ref, o_ref, *, M, F, HW, CHW, tn):
    # x_ref: (tn, CHW), o_ref: (tn, CHW + F*HW), stat_ref: (M, F) f32
    o_ref[:, :CHW] = x_ref[...].astype(o_ref.dtype)
    # tn is a multiple of M and tiles start at multiples of M, so within this
    # tile row r corresponds to sample n with n % M == r % M.
    stat_t = jnp.tile(stat_ref[...], (tn // M, 1))                       # (tn, F)
    tail_parts = [jnp.broadcast_to(stat_t[:, f:f + 1], (tn, HW)) for f in range(F)]
    tail = jnp.concatenate(tail_parts, axis=-1)                          # (tn, F*HW)
    o_ref[:, CHW:] = tail.astype(o_ref.dtype)                            # one contiguous store


def _pick_row_tile(N, M, row_bytes, budget):
    """Row tile for fallback pass 2: divides N, multiple of M, and (multiple of
    8 or == N).  Picks the largest tile whose double-buffered footprint fits
    the budget; otherwise the smallest valid tile (the caller then raises the
    scoped VMEM limit to cover it instead of silently overflowing)."""
    valid = [tn for tn in range(1, N + 1)
             if N % tn == 0 and tn % M == 0 and (tn % 8 == 0 or tn == N)]
    fitting = [tn for tn in valid if 2 * tn * row_bytes <= budget]
    if fitting:
        return max(fitting)
    return min(valid)


# --------------------------------------------------------------------------
# Wrapper
# --------------------------------------------------------------------------
def minibatch_stddev(x, group_size: int, num_channels: int = 1,
                     force_two_pass: bool = False):
    N, C, H, W = x.shape
    G = group_size if N % group_size == 0 else N   # same silent fallback as the torch module
    F = num_channels
    assert C % F == 0, "C must be divisible by num_channels"
    M = N // G
    HW = H * W
    CHW = C * HW
    cHW = (C // F) * HW
    out_cols = CHW + F * HW
    itemsize = jnp.dtype(x.dtype).itemsize

    cap = _tpu_vmem_capacity_bytes()
    budget = (cap * 3) // 8            # total double-buffered block budget per call

    tm = None if force_two_pass else _pick_member_tile(M, G, CHW, out_cols, itemsize, budget)

    # ----- primary: fused single pass -----------------------------------------
    if tm is not None:
        x3 = x.reshape(G, M, CHW)                                  # free reshape
        blk_bytes = (2 * G * tm * (CHW + out_cols) * itemsize      # dbuf'd in+out blocks
                     + 4 * G * tm * CHW * 4)                       # f32 temporaries margin
        out3 = pl.pallas_call(
            functools.partial(_fused_kernel, G=G, TM=tm, F=F, cHW=cHW, CHW=CHW, HW=HW),
            out_shape=jax.ShapeDtypeStruct((G, M, out_cols), x.dtype),
            grid=(M // tm,),
            in_specs=[pl.BlockSpec((G, tm, CHW), lambda i: (0, i, 0))],
            out_specs=pl.BlockSpec((G, tm, out_cols), lambda i: (0, i, 0)),
            compiler_params=pltpu.CompilerParams(
                dimension_semantics=("parallel",),                 # distinct out block per step
                vmem_limit_bytes=_vmem_limit_bytes(blk_bytes, cap)),
            cost_estimate=pl.CostEstimate(
                flops=int(4 * N * CHW),
                transcendentals=int(M * CHW),
                bytes_accessed=int(N * (CHW + out_cols) * itemsize)),
        )(x3)
        return out3.reshape(N, C + F, H, W)                        # free reshape

    # ----- fallback: two passes (only when the fused block cannot fit) --------
    # Pass 1: (M, F) statistic.
    x_grp = x.reshape(G, M * CHW)
    stat_shape = jax.ShapeDtypeStruct((M, F), jnp.float32)
    ce1 = pl.CostEstimate(flops=int(3 * N * CHW), transcendentals=int(M * CHW),
                          bytes_accessed=int(N * CHW * itemsize + M * F * 4))
    if M > 1 and CHW % 128 == 0:
        blk1 = 2 * G * CHW * itemsize + 4 * G * CHW * 4 + M * F * 4
        stat = pl.pallas_call(
            functools.partial(_stat_tile_kernel, F=F, cHW=cHW),
            out_shape=stat_shape,
            grid=(M,),
            in_specs=[pl.BlockSpec((G, CHW), lambda m: (0, m))],
            out_specs=pl.BlockSpec((M, F), lambda m: (0, 0)),
            compiler_params=pltpu.CompilerParams(
                dimension_semantics=("arbitrary",),
                vmem_limit_bytes=_vmem_limit_bytes(blk1, cap)),
            cost_estimate=ce1,
        )(x_grp)
    else:
        blk1 = G * M * CHW * itemsize + 4 * G * M * CHW * 4 + M * F * 4
        stat = pl.pallas_call(
            functools.partial(_stat_full_kernel, M=M, F=F, cHW=cHW),
            out_shape=stat_shape,
            grid=(1,),
            in_specs=[pl.BlockSpec((G, M * CHW), lambda i: (0, 0))],
            out_specs=pl.BlockSpec((M, F), lambda i: (0, 0)),
            compiler_params=pltpu.CompilerParams(
                dimension_semantics=("arbitrary",),
                vmem_limit_bytes=_vmem_limit_bytes(blk1, cap)),
            cost_estimate=ce1,
        )(x_grp)

    # Pass 2: pass-through copy + stat channels, tiled over batch rows.
    x2 = x.reshape(N, CHW)
    row_bytes = (CHW + out_cols) * itemsize
    tn = _pick_row_tile(N, M, row_bytes, budget)
    blk2 = 2 * tn * row_bytes + M * F * 4
    out2 = pl.pallas_call(
        functools.partial(_copy_concat_kernel, M=M, F=F, HW=HW, CHW=CHW, tn=tn),
        out_shape=jax.ShapeDtypeStruct((N, out_cols), x.dtype),
        grid=(N // tn,),
        in_specs=[pl.BlockSpec((M, F), lambda i: (0, 0)),      # tiny stat, constant
                  pl.BlockSpec((tn, CHW), lambda i: (i, 0))],  # pipelined x rows
        out_specs=pl.BlockSpec((tn, out_cols), lambda i: (i, 0)),
        compiler_params=pltpu.CompilerParams(
            dimension_semantics=("parallel",),
            vmem_limit_bytes=_vmem_limit_bytes(blk2, cap)),
        cost_estimate=pl.CostEstimate(
            flops=0, transcendentals=0,
            bytes_accessed=int((N * CHW + N * out_cols) * itemsize + M * F * 4)),
    )(stat, x2)
    return out2.reshape(N, C + F, H, W)


# --------------------------------------------------------------------------
# Pure-JAX reference (transcription of the PyTorch forward) for validation
# --------------------------------------------------------------------------
def _reference(x, group_size: int, num_channels: int = 1):
    N, C, H, W = x.shape
    G = group_size if N % group_size == 0 else N
    F = num_channels
    c = C // F
    y = x.reshape(G, -1, F, c, H, W)
    y = y - jnp.mean(y, axis=0)
    y = jnp.mean(y ** 2, axis=0)
    y = jnp.sqrt(y + 1e-8)
    y = jnp.mean(y, axis=(2, 3, 4))
    y = y.reshape(-1, F, 1, 1)
    y = jnp.tile(y, (G, 1, H, W))
    return jnp.concatenate([x, y], axis=1)


if __name__ == "__main__":
    cases = [
        # (shape,            group_size, num_channels, force_two_pass)
        ((8, 4, 16, 16),     4,          2,            False),  # primary fused path
        ((16, 8, 8, 8),      4,          1,            False),  # fused, F=1
        ((16, 8, 8, 8),      4,          1,            True),   # two-pass fallback (tiled stat)
        ((8, 3, 10, 10),     4,          1,            False),  # fused, unaligned C*H*W
        ((8, 3, 10, 10),     4,          1,            True),   # two-pass fallback (full stat)
        ((6, 4, 8, 8),       4,          1,            False),  # N % group_size != 0 -> G = N
    ]
    keys = jax.random.split(jax.random.PRNGKey(0), len(cases))
    for kk, (shape, gs, nc, force) in zip(keys, cases):
        x = jax.random.normal(kk, shape, dtype=jnp.float32)
        out = jax.block_until_ready(minibatch_stddev(x, gs, nc, force_two_pass=force))
        ref = _reference(x, gs, nc)
        N, C, H, W = shape
        assert out.shape == (N, C + nc, H, W), (out.shape, shape)
        assert jnp.allclose(out, ref, atol=1e-5, rtol=1e-5), f"mismatch vs reference for {shape}"
    print("KERNEL_OK")
</pallas_src>

<mosaic_0001>
module attributes {stable_mosaic.version = 11 : i64} {
  func.func @_fused_kernel(%arg0: i32, %arg1: memref<4x2x1024xf32, #tpu.memory_space<vmem>>, %arg2: memref<4x2x1536xf32, #tpu.memory_space<vmem>>) attributes {dimension_semantics = [#tpu.dimension_semantics<parallel>], iteration_bounds = array<i64: 1>, scalar_prefetch = 0 : i64, scratch_operands = 0 : i64, tpu.core_type = #tpu.core_type<tc>, window_params = [{transform_indices = @transform_0, window_bounds = array<i64: 4, 2, 1024>}, {transform_indices = @transform_1, window_bounds = array<i64: 4, 2, 1536>}]} {
    %c0 = arith.constant 0 : index
    %c0_0 = arith.constant 0 : index
    %c0_1 = arith.constant 0 : index
    %0 = vector.load %arg1[%c0, %c0_0, %c0_1] : memref<4x2x1024xf32, #tpu.memory_space<vmem>>, vector<4x2x1024xf32>
    %cst = arith.constant dense<0.000000e+00> : vector<2x1024xf32>
    %1 = vector.multi_reduction <add>, %0, %cst [0] : vector<4x2x1024xf32> to vector<2x1024xf32>
    %cst_2 = arith.constant 4.000000e+00 : f32
    %2 = vector.broadcast %cst_2 : f32 to vector<2x1024xf32>
    %3 = arith.divf %1, %2 : vector<2x1024xf32>
    %4 = vector.shape_cast %3 : vector<2x1024xf32> to vector<1x2x1024xf32>
    %5 = vector.broadcast %4 : vector<1x2x1024xf32> to vector<4x2x1024xf32>
    %6 = arith.subf %0, %5 : vector<4x2x1024xf32>
    %7 = arith.mulf %6, %6 : vector<4x2x1024xf32>
    %cst_3 = arith.constant dense<0.000000e+00> : vector<2x1024xf32>
    %8 = vector.multi_reduction <add>, %7, %cst_3 [0] : vector<4x2x1024xf32> to vector<2x1024xf32>
    %cst_4 = arith.constant 4.000000e+00 : f32
    %9 = vector.broadcast %cst_4 : f32 to vector<2x1024xf32>
    %10 = arith.divf %8, %9 : vector<2x1024xf32>
    %cst_5 = arith.constant 9.99999993E-9 : f32
    %11 = vector.broadcast %cst_5 : f32 to vector<2x1024xf32>
    %12 = arith.addf %10, %11 : vector<2x1024xf32>
    %13 = math.sqrt %12 : vector<2x1024xf32>
    %c0_6 = arith.constant 0 : index
    %c0_7 = arith.constant 0 : index
    %c0_8 = arith.constant 0 : index
    %14 = vector.load %arg1[%c0_6, %c0_7, %c0_8] : memref<4x2x1024xf32, #tpu.memory_space<vmem>>, vector<4x2x1024xf32>
    %c0_9 = arith.constant 0 : index
    %c0_10 = arith.constant 0 : index
    %c0_11 = arith.constant 0 : index
    %15 = vector.load %arg2[%c0_9, %c0_10, %c0_11] : memref<4x2x1536xf32, #tpu.memory_space<vmem>>, vector<4x2x1024xf32>
    tpu.vector_store %arg2[%c0_9, %c0_10, %c0_11], %14 {strides = array<i32>} : memref<4x2x1536xf32, #tpu.memory_space<vmem>>, vector<4x2x1024xf32>,
    %16 = vector.extract_strided_slice %13 {offsets = [0, 0], sizes = [2, 512], strides = [1, 1]} : vector<2x1024xf32> to vector<2x512xf32>
    %cst_12 = arith.constant dense<0.000000e+00> : vector<2xf32>
    %17 = vector.multi_reduction <add>, %16, %cst_12 [1] : vector<2x512xf32> to vector<2xf32>
    %18 = vector.shape_cast %17 : vector<2xf32> to vector<2x1xf32>
    %cst_13 = arith.constant 5.120000e+02 : f32
    %19 = vector.broadcast %cst_13 : f32 to vector<2x1xf32>
    %20 = arith.divf %18, %19 : vector<2x1xf32>
    %21 = vector.shape_cast %20 : vector<2x1xf32> to vector<2x1xf32>
    %22 = vector.broadcast %21 : vector<2x1xf32> to vector<2x256xf32>
    %23 = vector.extract_strided_slice %13 {offsets = [0, 512], sizes = [2, 512], strides = [1, 1]} : vector<2x1024xf32> to vector<2x512xf32>
    %cst_14 = arith.constant dense<0.000000e+00> : vector<2xf32>
    %24 = vector.multi_reduction <add>, %23, %cst_14 [1] : vector<2x512xf32> to vector<2xf32>
    %25 = vector.shape_cast %24 : vector<2xf32> to vector<2x1xf32>
    %cst_15 = arith.constant 5.120000e+02 : f32
    %26 = vector.broadcast %cst_15 : f32 to vector<2x1xf32>
    %27 = arith.divf %25, %26 : vector<2x1xf32>
    %28 = vector.shape_cast %27 : vector<2x1xf32> to vector<2x1xf32>
    %29 = vector.broadcast %28 : vector<2x1xf32> to vector<2x256xf32>
    %30 = tpu.concatenate %22, %29 in 1 : vector<2x256xf32>, vector<2x256xf32> -> vector<2x512xf32>
    %31 = vector.shape_cast %30 : vector<2x512xf32> to vector<1x2x512xf32>
    %32 = vector.shape_cast %31 : vector<1x2x512xf32> to vector<1x2x512xf32>
    %33 = vector.broadcast %32 : vector<1x2x512xf32> to vector<4x2x512xf32>
    %c0_16 = arith.constant 0 : index
    %c0_17 = arith.constant 0 : index
    %c1024 = arith.constant 1024 : index
    %34 = vector.load %arg2[%c0_16, %c0_17, %c1024] : memref<4x2x1536xf32, #tpu.memory_space<vmem>>, vector<4x2x512xf32>
    tpu.vector_store %arg2[%c0_16, %c0_17, %c1024], %33 {strides = array<i32>} : memref<4x2x1536xf32, #tpu.memory_space<vmem>>, vector<4x2x512xf32>,
    return
  }
  func.func @transform_0(%arg0: i32) -> (i32, i32, i32) {
    %c0_i32 = arith.constant 0 : i32
    %c0_i32_0 = arith.constant 0 : i32
    %c0_i32_1 = arith.constant 0 : i32
    return %c0_i32, %arg0, %c0_i32_0 : i32, i32, i32
  }
  func.func @transform_1(%arg0: i32) -> (i32, i32, i32) {
    %c0_i32 = arith.constant 0 : i32
    %c0_i32_0 = arith.constant 0 : i32
    %c0_i32_1 = arith.constant 0 : i32
    return %c0_i32, %arg0, %c0_i32_0 : i32, i32, i32
  }
}

</mosaic_0001>

<bundles_post_ra>
// kernel: tpu_custom_call.1
= control target key start
LH: loop header
LB: loop body
LE: loop exit
PB: predicated region body
PF: predicated region fallthrough
CT: control target
= control target key end

     0   :  { %6 = vsyncpa [#allocation3], 0  ;;  %s1014_s0 = inlined_call_operand.hbm [shape: f32[4,2,1024], index: 0, kind: input, shape index: {}]   ;;  %s1015_s1 = inlined_call_operand.hbm [shape: f32[4,2,1536], index: 1, kind: output, shape index: {}]  }
   0x1   :  { %7 = vsyncpa [#allocation4], 0  ;;  %s782_s6 = smov [#allocation2]  }
   0x2   :  { %s13_s7 = sshll.u32 %s782_s6, 4  ;;  %s14_s7 = int_to_ptr.vmem [resolvable:$true] %s13_s7 }
   0x3   :  { %s746_s8 = scalar_lea.vmem %s14_s7, 1024  ;;  %p751_p1 = scmp.lt.s32.totalorder %s14_s7, %s14_s7 }
   0x4   :  { %p747_p0 = scmp.ne.s32.totalorder %s14_s7, %s746_s8  ;;  %p752_p2 = scmp.lt.s32.totalorder %s746_s8, %s746_s8 }
   0x6   :  { %p753_p3 = por %p752_p2, %p751_p1 }
   0x8   :  { %p754_p4 = pnand %p753_p3, %p747_p0 }
   0xa   :  { %757 = shalt.err (!%p754_p4)
}
   0xb   :  { %s783_s9 = smov 256   ;;  %s784_s10 = smov 16  }
   0xc   :  { %19 = dma.hbm_to_vmem [thread:$0]  %s1014_s0, 1024, %s14_s7, [#allocation3], %s783_s9, %s783_s9, %s784_s10  }
   0xd   :  { %778 = dma.done.wait [#allocation3], 1024  }
   0xe   :  { %779 = vsyncadd [#allocation3], 4294966272  ;;  %v43_v0 = vlaneseq  ;;  %v785_v1 = vmov 1983009808   ;;  %v804_v6 = vld [vmem:[#allocation2] sm:$0xff]  ;;  %v806_v7 = vld [vmem:[#allocation2 + $0x10] sm:$0xff] }
   0xf   :  { %v41_v2 = vunpack.c.l.s4 %v785_v1  ;;  %v808_v8 = vld [vmem:[#allocation2 + $0x20] sm:$0xff]  ;;  %vm207_vm0 = vcmask 1041408   ;;  %v810_v9 = vld [vmem:[#allocation2 + $0x30] sm:$0xff]  ;;  %v39_v10 = vcombine.high %v804_v6, %v804_v6  ;;  %v73_v12 = vcombine.high %v806_v7, %v806_v7  ;;  %637 = vst [vmem:[#allocation5] sm:$0xff] %v804_v6  ;;  %639 = vst [vmem:[#allocation5 + $0x18] sm:$0xff] %v806_v7  ;;  %s786_s0 = smov [#allocation5]  }
  0x10   :  { %v44_v3 = vshrl.u32 %v43_v0, 7  ;;  %641 = vst [vmem:[#allocation5 + $0x30] sm:$0xff] %v808_v8  ;;  %v823_v14 = vld [vmem:[#allocation2 + $0x8] sm:$0xff]  ;;  %v825_v15 = vld [vmem:[#allocation2 + $0x18] sm:$0xff]  ;;  %v107_v16 = vcombine.high %v808_v8, %v808_v8  ;;  %v141_v18 = vcombine.high %v810_v9, %v810_v9  ;;  %643 = vst [vmem:[#allocation5 + $0x48] sm:$0xff] %v810_v9  ;;  %s695_s13 = sshll.u32 %s786_s0, 4  ;;  %s696_s13 = int_to_ptr.vmem [resolvable:$true] %s695_s13 }
  0x11   :  { %v42_v4 = vunpack.c.0.s8 %v41_v2  ;;  %v836_v20 = vld [vmem:[#allocation2 + $0x28] sm:$0xff]  ;;  %v838_v21 = vld [vmem:[#allocation2 + $0x38] sm:$0xff]  ;;  %638 = vst [vmem:[#allocation5 + $0x8] sm:$0xff] %v823_v14  ;;  %640 = vst [vmem:[#allocation5 + $0x20] sm:$0xff] %v825_v15  ;;  %v56_v57 = vcombine.high %v823_v14, %v823_v14  ;;  %v90_v0 = vcombine.high %v825_v15, %v825_v15  ;;  %s758_s14 = scalar_lea.vmem %s696_s13, 1536  ;;  %p763_p6 = scmp.lt.s32.totalorder %s696_s13, %s696_s13 }
  0x12   :  { %642 = vst [vmem:[#allocation5 + $0x38] sm:$0xff] %v836_v20  ;;  %644 = vst [vmem:[#allocation5 + $0x50] sm:$0xff] %v838_v21  ;;  %p759_p5 = scmp.ne.s32.totalorder %s696_s13, %s758_s14  ;;  %p764_p7 = scmp.lt.s32.totalorder %s758_s14, %s758_s14 }
  0x13   :  { %v802_v5 = vsub.s32 %v42_v4, %v44_v3 }
  0x14   :  { %p765_p8 = por %p764_p7, %p763_p6 }
  0x15   :  { %v46_v11 = vrot.slane %v804_v6, %v802_v5  ;;  %v80_v13 = vrot.slane %v806_v7, %v802_v5  ;;  %v114_v17 = vrot.slane %v808_v8, %v802_v5  ;;  %v148_v19 = vrot.slane %v810_v9, %v802_v5 }
  0x16   :  { %v53_v22 = vrot.slane %v39_v10, %v802_v5  ;;  %v87_v24 = vrot.slane %v73_v12, %v802_v5  ;;  %v121_v26 = vrot.slane %v107_v16, %v802_v5  ;;  %v155_v28 = vrot.slane %v141_v18, %v802_v5  ;;  %p766_p9 = pnand %p765_p8, %p759_p5 }
  0x17   :  { %v54_v23 = vcombine.high %v46_v11, %v46_v11  ;;  %v88_v25 = vcombine.high %v80_v13, %v80_v13  ;;  %v122_v27 = vcombine.high %v114_v17, %v114_v17  ;;  %v156_v29 = vcombine.high %v148_v19, %v148_v19 }
  0x18   :  { %v55_v30 = vcombine.high %v53_v22, %v53_v22  ;;  %v89_v31 = vcombine.high %v87_v24, %v87_v24  ;;  %v208_v32 = vsel %vm207_vm0, %v46_v11, 0.0  ;;  %v209_v33 = vsel %vm207_vm0, %v80_v13, 0.0 }
  0x19   :  { %v123_v34 = vcombine.high %v121_v26, %v121_v26  ;;  %v157_v35 = vcombine.high %v155_v28, %v155_v28  ;;  %v210_v36 = vadd.f32 %v209_v33, %v208_v32  ;;  %v211_v37 = vsel %vm207_vm0, %v114_v17, 0.0 }
  0x1a   :  { %v213_v38 = vsel %vm207_vm0, %v148_v19, 0.0  ;;  %v215_v39 = vsel %vm207_vm0, %v54_v23, 0.0  ;;  %v216_v40 = vsel %vm207_vm0, %v88_v25, 0.0  ;;  %v218_v41 = vsel %vm207_vm0, %v122_v27, 0.0 }
  0x1b   :  { %v212_v42 = vadd.f32 %v211_v37, %v210_v36  ;;  %v217_v43 = vadd.f32 %v216_v40, %v215_v39  ;;  %v220_v44 = vsel %vm207_vm0, %v156_v29, 0.0  ;;  %v222_v45 = vsel %vm207_vm0, %v53_v22, 0.0 }
  0x1c   :  { %v223_v46 = vsel %vm207_vm0, %v87_v24, 0.0  ;;  %v225_v47 = vsel %vm207_vm0, %v121_v26, 0.0  ;;  %v227_v48 = vsel %vm207_vm0, %v155_v28, 0.0  ;;  %v229_v49 = vsel %vm207_vm0, %v55_v30, 0.0 }
  0x1d   :  { %v214_v50 = vadd.f32 %v213_v38, %v212_v42  ;;  %v219_v51 = vadd.f32 %v218_v41, %v217_v43  ;;  %v224_v52 = vadd.f32 %v223_v46, %v222_v45  ;;  %v230_v53 = vsel %vm207_vm0, %v89_v31, 0.0 }
  0x1e   :  { %v231_v54 = vadd.f32 %v230_v53, %v229_v49  ;;  %v232_v55 = vsel %vm207_vm0, %v123_v34, 0.0  ;;  %v234_v56 = vsel %vm207_vm0, %v157_v35, 0.0  ;;  %v63_v61 = vrot.slane %v823_v14, %v802_v5 }
  0x1f   :  { %v221_v58 = vadd.f32 %v220_v44, %v219_v51  ;;  %v226_v59 = vadd.f32 %v225_v47, %v224_v52  ;;  %v265_v60 = vmul.f32 0.25, %v214_v50  ;;  %v70_v63 = vrot.slane %v56_v57, %v802_v5 }
  0x20   :  { %v233_v62 = vadd.f32 %v232_v55, %v231_v54  ;;  %v97_v1 = vrot.slane %v825_v15, %v802_v5  ;;  %v71_v4 = vcombine.high %v63_v61, %v63_v61  ;;  %v124_v10 = vcombine.high %v836_v20, %v836_v20 }
  0x21   :  { %v228_v2 = vadd.f32 %v227_v48, %v226_v59  ;;  %v266_v3 = vmul.f32 0.25, %v221_v58  ;;  %v72_v12 = vcombine.high %v70_v63, %v70_v63  ;;  %v104_v13 = vrot.slane %v90_v0, %v802_v5 }
  0x22   :  { %v235_v11 = vadd.f32 %v234_v56, %v233_v62  ;;  %v105_v16 = vcombine.high %v97_v1, %v97_v1  ;;  %v131_v19 = vrot.slane %v836_v20, %v802_v5  ;;  %v138_v22 = vrot.slane %v124_v10, %v802_v5 }
  0x23   :  { %v267_v17 = vmul.f32 0.25, %v228_v2  ;;  %v281_v18 = vcombine.low %v265_v60, %v266_v3  ;;  %v106_v24 = vcombine.high %v104_v13, %v104_v13  ;;  %v158_v25 = vcombine.high %v838_v21, %v838_v21 }
  0x24   :  { %v268_v23 = vmul.f32 0.25, %v235_v11  ;;  %v165_v26 = vrot.slane %v838_v21, %v802_v5  ;;  %v139_v28 = vcombine.high %v131_v19, %v131_v19  ;;  %v140_v29 = vcombine.high %v138_v22, %v138_v22 }
  0x25   :  { %v289_v27 = vrot.slane %v281_v18, %v802_v5  ;;  %v236_v30 = vsel %vm207_vm0, %v63_v61, 0.0  ;;  %v172_v32 = vrot.slane %v158_v25, %v802_v5  ;;  %v237_v34 = vsel %vm207_vm0, %v97_v1, 0.0 }
  0x26   :  { %v282_v31 = vcombine.low %v267_v17, %v268_v23  ;;  %v173_v33 = vcombine.high %v165_v26, %v165_v26  ;;  %v238_v35 = vadd.f32 %v237_v34, %v236_v30  ;;  %v239_v36 = vsel %vm207_vm0, %v131_v19, 0.0 }
  0x27   :  { %v241_v37 = vsel %vm207_vm0, %v165_v26, 0.0  ;;  %v243_v38 = vsel %vm207_vm0, %v71_v4, 0.0  ;;  %v174_v40 = vcombine.high %v172_v32, %v172_v32  ;;  %v244_v41 = vsel %vm207_vm0, %v105_v16, 0.0 }
  0x28   :  { %v296_v39 = vrot.slane %v282_v31, %v802_v5  ;;  %v246_v42 = vsel %vm207_vm0, %v139_v28, 0.0  ;;  %v240_v43 = vadd.f32 %v239_v36, %v238_v35  ;;  %v245_v44 = vadd.f32 %v244_v41, %v243_v38 }
  0x29   :  { %v248_v45 = vsel %vm207_vm0, %v173_v33, 0.0  ;;  %v250_v46 = vsel %vm207_vm0, %v70_v63, 0.0  ;;  %v251_v48 = vsel %vm207_vm0, %v104_v13, 0.0  ;;  %v253_v49 = vsel %vm207_vm0, %v138_v22, 0.0 }
  0x2a   :  { %v297_v47 = vcombine.low %v289_v27, %v296_v39  ;;  %v255_v50 = vsel %vm207_vm0, %v172_v32, 0.0  ;;  %v242_v51 = vadd.f32 %v241_v37, %v240_v43  ;;  %v247_v52 = vadd.f32 %v246_v42, %v245_v44 }
  0x2b   :  { %v252_v53 = vadd.f32 %v251_v48, %v250_v46  ;;  %v257_v54 = vsel %vm207_vm0, %v72_v12, 0.0  ;;  %v258_v61 = vsel %vm207_vm0, %v106_v24, 0.0  ;;  %v260_v62 = vsel %vm207_vm0, %v140_v29, 0.0 }
  0x2c   :  { %v317_v55 = vsub.f32 %v804_v6, %v297_v47  ;;  %v319_v56 = vsub.f32 %v806_v7, %v297_v47  ;;  %v321_v57 = vsub.f32 %v808_v8, %v297_v47  ;;  %v323_v58 = vsub.f32 %v810_v9, %v297_v47 }
  0x2d   :  { %v249_v59 = vadd.f32 %v248_v45, %v247_v52  ;;  %v254_v60 = vadd.f32 %v253_v49, %v252_v53  ;;  %v259_v4 = vadd.f32 %v258_v61, %v257_v54  ;;  %v262_v6 = vsel %vm207_vm0, %v174_v40, 0.0 }
  0x2e   :  { %v325_v63 = vmul.f32 %v317_v55, %v317_v55  ;;  %v327_v0 = vmul.f32 %v319_v56, %v319_v56  ;;  %v329_v1 = vmul.f32 %v321_v57, %v321_v57  ;;  %v331_v2 = vmul.f32 %v323_v58, %v323_v58 }
  0x2f   :  { %v256_v3 = vadd.f32 %v255_v50, %v254_v60  ;;  %v906_v10 = vmul.f32 0.25, %v242_v51  ;;  %v261_v55 = vadd.f32 %v260_v62, %v259_v4  ;;  %v270_v60 = vmul.f32 0.25, %v249_v59 }
  0x30   :  { %v341_v7 = vcombine.high %v325_v63, %v325_v63  ;;  %v348_v8 = vrot.slane %v325_v63, %v802_v5  ;;  %v375_v9 = vcombine.high %v327_v0, %v327_v0  ;;  %v382_v11 = vrot.slane %v327_v0, %v802_v5 }
  0x31   :  { %v409_v12 = vcombine.high %v329_v1, %v329_v1  ;;  %v416_v13 = vrot.slane %v329_v1, %v802_v5  ;;  %v443_v16 = vcombine.high %v331_v2, %v331_v2  ;;  %v450_v17 = vrot.slane %v331_v2, %v802_v5 }
  0x32   :  { %v355_v18 = vrot.slane %v341_v7, %v802_v5  ;;  %v356_v19 = vcombine.high %v348_v8, %v348_v8  ;;  %v389_v22 = vrot.slane %v375_v9, %v802_v5  ;;  %v390_v23 = vcombine.high %v382_v11, %v382_v11 }
  0x33   :  { %v423_v24 = vrot.slane %v409_v12, %v802_v5  ;;  %v424_v25 = vcombine.high %v416_v13, %v416_v13  ;;  %v457_v26 = vrot.slane %v443_v16, %v802_v5  ;;  %v458_v27 = vcombine.high %v450_v17, %v450_v17 }
  0x34   :  { %v357_v28 = vcombine.high %v355_v18, %v355_v18  ;;  %v391_v29 = vcombine.high %v389_v22, %v389_v22  ;;  %v509_v30 = vsel %vm207_vm0, %v348_v8, 0.0  ;;  %v510_v31 = vsel %vm207_vm0, %v382_v11, 0.0 }
  0x35   :  { %v425_v32 = vcombine.high %v423_v24, %v423_v24  ;;  %v459_v33 = vcombine.high %v457_v26, %v457_v26  ;;  %v511_v34 = vadd.f32 %v510_v31, %v509_v30  ;;  %v512_v35 = vsel %vm207_vm0, %v416_v13, 0.0 }
  0x36   :  { %v514_v36 = vsel %vm207_vm0, %v450_v17, 0.0  ;;  %v516_v37 = vsel %vm207_vm0, %v356_v19, 0.0  ;;  %v517_v38 = vsel %vm207_vm0, %v390_v23, 0.0  ;;  %v519_v39 = vsel %vm207_vm0, %v424_v25, 0.0 }
  0x37   :  { %v513_v40 = vadd.f32 %v512_v35, %v511_v34  ;;  %v518_v41 = vadd.f32 %v517_v38, %v516_v37  ;;  %v521_v42 = vsel %vm207_vm0, %v458_v27, 0.0  ;;  %v523_v43 = vsel %vm207_vm0, %v355_v18, 0.0 }
  0x38   :  { %v524_v44 = vsel %vm207_vm0, %v389_v22, 0.0  ;;  %v526_v45 = vsel %vm207_vm0, %v423_v24, 0.0  ;;  %v528_v46 = vsel %vm207_vm0, %v457_v26, 0.0  ;;  %v530_v47 = vsel %vm207_vm0, %v357_v28, 0.0 }
  0x39   :  { %v515_v48 = vadd.f32 %v514_v36, %v513_v40  ;;  %v520_v49 = vadd.f32 %v519_v39, %v518_v41  ;;  %v525_v50 = vadd.f32 %v524_v44, %v523_v43  ;;  %v531_v51 = vsel %vm207_vm0, %v391_v29, 0.0 }
  0x3a   :  { %v532_v52 = vadd.f32 %v531_v51, %v530_v47  ;;  %v533_v53 = vsel %vm207_vm0, %v425_v32, 0.0  ;;  %v535_v54 = vsel %vm207_vm0, %v459_v33, 0.0  ;;  %v263_v63 = vadd.f32 %v262_v6, %v261_v55 }
  0x3b   :  { %v522_v56 = vadd.f32 %v521_v42, %v520_v49  ;;  %v527_v57 = vadd.f32 %v526_v45, %v525_v50  ;;  %v565_v58 = vmul.f32 0.25, %v515_v48  ;;  %v271_v0 = vmul.f32 0.25, %v256_v3 }
  0x3c   :  { %v534_v61 = vadd.f32 %v533_v53, %v532_v52  ;;  %v272_v9 = vmul.f32 0.25, %v263_v63  ;;  %v298_v11 = vcombine.low %v906_v10, %v270_v60 }
  0x3d   :  { %v529_v1 = vadd.f32 %v528_v46, %v527_v57  ;;  %v566_v2 = vmul.f32 0.25, %v522_v56  ;;  %v573_v7 = vadd.f32 1e-08, %v565_v58 }
  0x3e   :  { %v536_v8 = vadd.f32 %v535_v54, %v534_v61  ;;  %v299_v62 = vcombine.low %v271_v0, %v272_v9  ;;  %v306_v3 = vrot.slane %v298_v11, %v802_v5 }
  0x3f   :  { %v567_v12 = vmul.f32 0.25, %v529_v1  ;;  %v933_v13 = vadd.f32 1e-08, %v566_v2  ;;  %722 = vrsqrt.f32 %v573_v7  ;;  %vm583_vm1 = vcmp.eq.f32.partialorder %v573_v7, inf }
  0x40   :  { %v568_v16 = vmul.f32 0.25, %v536_v8  ;;  %v313_v6 = vrot.slane %v299_v62, %v802_v5  ;;  %vm585_vm2 = vcmp.eq.f32.partialorder %v573_v7, 0.0  ;;  %v586_v17 = vand.u32 2147483648, %v573_v7 }
  0x41   :  { %v935_v4 = vadd.f32 1e-08, %v567_v12  ;;  %724 = vrsqrt.f32 %v933_v13  ;;  %vm590_vm3 = vcmp.eq.f32.partialorder %v933_v13, inf  ;;  %vm592_vm4 = vcmp.eq.f32.partialorder %v933_v13, 0.0 }
  0x42   :  { %v938_v59 = vadd.f32 1e-08, %v568_v16  ;;  %v314_v10 = vcombine.low %v306_v3, %v313_v6  ;;  %v593_v24 = vand.u32 2147483648, %v933_v13 }
  0x43   :  { %726 = vrsqrt.f32 %v935_v4  ;;  %vm597_vm5 = vcmp.eq.f32.partialorder %v935_v4, inf  ;;  %vm599_vm6 = vcmp.eq.f32.partialorder %v935_v4, 0.0 }
  0x44   :  { %728 = vrsqrt.f32 %v938_v59  ;;  %v318_v18 = vsub.f32 %v823_v14, %v314_v10  ;;  %v320_v19 = vsub.f32 %v825_v15, %v314_v10  ;;  %v322_v22 = vsub.f32 %v836_v20, %v314_v10 }
  0x45   :  { %v324_v23 = vsub.f32 %v838_v21, %v314_v10  ;;  %v600_v15 = vand.u32 2147483648, %v935_v4  ;;  %vm604_vm7 = vcmp.eq.f32.partialorder %v938_v59, inf  ;;  %vm606_vm8 = vcmp.eq.f32.partialorder %v938_v59, 0.0 }
  0x46   :  { %v326_v25 = vmul.f32 %v318_v18, %v318_v18  ;;  %v328_v26 = vmul.f32 %v320_v19, %v320_v19  ;;  %v330_v27 = vmul.f32 %v322_v22, %v322_v22  ;;  %v607_v20 = vand.u32 2147483648, %v938_v59 }
  0x47   :  { %v332_v14 = vmul.f32 %v324_v23, %v324_v23 }
  0x48   :  { %v358_v21 = vcombine.high %v326_v25, %v326_v25  ;;  %v365_v28 = vrot.slane %v326_v25, %v802_v5  ;;  %v392_v29 = vcombine.high %v328_v26, %v328_v26  ;;  %v399_v30 = vrot.slane %v328_v26, %v802_v5 }
  0x49   :  { %v426_v32 = vcombine.high %v330_v27, %v330_v27  ;;  %v433_v33 = vrot.slane %v330_v27, %v802_v5  ;;  %v460_v34 = vcombine.high %v332_v14, %v332_v14  ;;  %v467_v35 = vrot.slane %v332_v14, %v802_v5 }
  0x4a   :  { %v372_v37 = vrot.slane %v358_v21, %v802_v5  ;;  %v373_v38 = vcombine.high %v365_v28, %v365_v28  ;;  %v406_v39 = vrot.slane %v392_v29, %v802_v5  ;;  %v407_v41 = vcombine.high %v399_v30, %v399_v30 }
  0x4b   :  { %v440_v42 = vrot.slane %v426_v32, %v802_v5  ;;  %v441_v43 = vcombine.high %v433_v33, %v433_v33  ;;  %v474_v44 = vrot.slane %v460_v34, %v802_v5  ;;  %v475_v52 = vcombine.high %v467_v35, %v467_v35 }
  0x4c   :  { %v723_v31 = vpop.eup %722  ;;  %v374_v47 = vcombine.high %v372_v37, %v372_v37  ;;  %v408_v48 = vcombine.high %v406_v39, %v406_v39  ;;  %v537_v58 = vsel %vm207_vm0, %v365_v28, 0.0  ;;  %v538_v63 = vsel %vm207_vm0, %v399_v30, 0.0 }
  0x4d   :  { %v582_v36 = vmul.f32 %v723_v31, %v573_v7  ;;  %v442_v51 = vcombine.high %v440_v42, %v440_v42  ;;  %v476_v53 = vcombine.high %v474_v44, %v474_v44  ;;  %v540_v0 = vsel %vm207_vm0, %v433_v33, 0.0 }
  0x4e   :  { %v725_v40 = vpop.eup %724  ;;  %v542_v8 = vsel %vm207_vm0, %v467_v35, 0.0  ;;  %v545_v6 = vsel %vm207_vm0, %v407_v41, 0.0  ;;  %v547_v18 = vsel %vm207_vm0, %v441_v43, 0.0  ;;  %v549_v22 = vsel %vm207_vm0, %v475_v52, 0.0 }
  0x4f   :  { %v584_v45 = vsel %vm583_vm1, %v573_v7, %v582_v36  ;;  %v589_v46 = vmul.f32 %v725_v40, %v933_v13  ;;  %v539_v7 = vadd.f32 %v538_v63, %v537_v58  ;;  %v551_v23 = vsel %vm207_vm0, %v372_v37, 0.0 }
  0x50   :  { %v727_v49 = vpop.eup %726  ;;  %v587_v50 = vsel %vm585_vm2, %v586_v17, %v584_v45  ;;  %v554_v27 = vsel %vm207_vm0, %v440_v42, 0.0  ;;  %v556_v14 = vsel %vm207_vm0, %v474_v44, 0.0  ;;  %v561_v21 = vsel %vm207_vm0, %v442_v51, 0.0 }
  0x51   :  { %v729_v54 = vpop.eup %728  ;;  %v591_v55 = vsel %vm590_vm3, %v933_v13, %v589_v46  ;;  %v596_v56 = vmul.f32 %v727_v49, %v935_v4  ;;  %v645_v57 = vsel %vm207_vm0, %v587_v50, 0.0  ;;  %v544_v13 = vsel %vm207_vm0, %v373_v38, 0.0 }
  0x52   :  { %v594_v60 = vsel %vm592_vm4, %v593_v24, %v591_v55  ;;  %v603_v61 = vmul.f32 %v729_v54, %v938_v59  ;;  %v541_v3 = vadd.f32 %v540_v0, %v539_v7  ;;  %v552_v24 = vsel %vm207_vm0, %v406_v39, 0.0 }
  0x53   :  { %v598_v1 = vsel %vm597_vm5, %v935_v4, %v596_v56  ;;  %v646_v2 = vsel %vm207_vm0, %v594_v60, 0.0  ;;  %v546_v4 = vadd.f32 %v545_v6, %v544_v13  ;;  %v553_v26 = vadd.f32 %v552_v24, %v551_v23 }
  0x54   :  { %v601_v9 = vsel %vm599_vm6, %v600_v15, %v598_v1  ;;  %v605_v11 = vsel %vm604_vm7, %v938_v59, %v603_v61  ;;  %v647_v12 = vadd.f32 %v646_v2, %v645_v57  ;;  %v543_v19 = vadd.f32 %v542_v8, %v541_v3 }
  0x55   :  { %v608_v16 = vsel %vm606_vm8, %v607_v20, %v605_v11  ;;  %v648_v62 = vsel %vm207_vm0, %v601_v9, 0.0  ;;  %v548_v25 = vadd.f32 %v547_v18, %v546_v4  ;;  %v558_v15 = vsel %vm207_vm0, %v374_v47, 0.0 }
  0x56   :  { %v649_v10 = vadd.f32 %v648_v62, %v647_v12  ;;  %v650_v17 = vsel %vm207_vm0, %v608_v16, 0.0  ;;  %v559_v20 = vsel %vm207_vm0, %v408_v48, 0.0  ;;  %v555_v29 = vadd.f32 %v554_v27, %v553_v26 }
  0x57   :  { %v550_v28 = vadd.f32 %v549_v22, %v548_v25  ;;  %v560_v30 = vadd.f32 %v559_v20, %v558_v15  ;;  %v563_v31 = vsel %vm207_vm0, %v476_v53, 0.0  ;;  %v569_v32 = vmul.f32 0.25, %v543_v19 }
  0x58   :  { %v651_v59 = vadd.f32 %v650_v17, %v649_v10  ;;  %v557_v33 = vadd.f32 %v556_v14, %v555_v29 }
  0x59   :  { %v562_v34 = vadd.f32 %v561_v21, %v560_v30  ;;  %v570_v35 = vmul.f32 0.25, %v550_v28  ;;  %v577_v36 = vadd.f32 1e-08, %v569_v32 }
  0x5a   :  { %652 = vadd.xlane.f32.xlu0 %v651_v59  ;;  %v571_v38 = vmul.f32 0.25, %v557_v33 }
  0x5b   :  { %v564_v37 = vadd.f32 %v563_v31, %v562_v34  ;;  %v578_v39 = vadd.f32 1e-08, %v570_v35  ;;  %730 = vrsqrt.f32 %v577_v36  ;;  %vm611_vm9 = vcmp.eq.f32.partialorder %v577_v36, inf }
  0x5c   :  { %v579_v41 = vadd.f32 1e-08, %v571_v38  ;;  %v614_v44 = vand.u32 2147483648, %v577_v36  ;;  %vm613_vm10 = vcmp.eq.f32.partialorder %v577_v36, 0.0 }
  0x5d   :  { %v572_v40 = vmul.f32 0.25, %v564_v37  ;;  %732 = vrsqrt.f32 %v578_v39  ;;  %vm618_vm11 = vcmp.eq.f32.partialorder %v578_v39, inf  ;;  %v621_v47 = vand.u32 2147483648, %v578_v39 }
  0x5e   :  { %734 = vrsqrt.f32 %v579_v41  ;;  %vm620_vm12 = vcmp.eq.f32.partialorder %v578_v39, 0.0  ;;  %vm625_vm13 = vcmp.eq.f32.partialorder %v579_v41, inf  ;;  %v628_v51 = vand.u32 2147483648, %v579_v41 }
  0x5f   :  { %v580_v42 = vadd.f32 1e-08, %v572_v40  ;;  %vm627_vm14 = vcmp.eq.f32.partialorder %v579_v41, 0.0 }
  0x61   :  { %736 = vrsqrt.f32 %v580_v42  ;;  %vm632_vm15 = vcmp.eq.f32.partialorder %v580_v42, inf  ;;  %v635_v57 = vand.u32 2147483648, %v580_v42  ;;  %vm634_vm1 = vcmp.eq.f32.partialorder %v580_v42, 0.0 }
  0x68   :  { %v731_v43 = vpop.eup %730 }
  0x69   :  { %v610_v46 = vmul.f32 %v731_v43, %v577_v36 }
  0x6a   :  { %v733_v45 = vpop.eup %732 }
  0x6b   :  { %v617_v48 = vmul.f32 %v733_v45, %v578_v39  ;;  %v735_v49 = vpop.eup %734  ;;  %v612_v50 = vsel %vm611_vm9, %v577_v36, %v610_v46 }
  0x6c   :  { %v615_v52 = vsel %vm613_vm10, %v614_v44, %v612_v50  ;;  %v624_v54 = vmul.f32 %v735_v49, %v579_v41 }
  0x6d   :  { %v619_v53 = vsel %vm618_vm11, %v578_v39, %v617_v48  ;;  %v656_v58 = vsel %vm207_vm0, %v615_v52, 0.0 }
  0x6e   :  { %v737_v55 = vpop.eup %736  ;;  %v622_v56 = vsel %vm620_vm12, %v621_v47, %v619_v53  ;;  %v626_v60 = vsel %vm625_vm13, %v579_v41, %v624_v54 }
  0x6f   :  { %v631_v61 = vmul.f32 %v737_v55, %v580_v42  ;;  %v657_v63 = vsel %vm207_vm0, %v622_v56, 0.0  ;;  %v629_v0 = vsel %vm627_vm14, %v628_v51, %v626_v60 }
  0x70   :  { %v658_v1 = vadd.f32 %v657_v63, %v656_v58  ;;  %v659_v7 = vsel %vm207_vm0, %v629_v0, 0.0 }
  0x71   :  { %v633_v2 = vsel %vm632_vm15, %v580_v42, %v631_v61 }
  0x72   :  { %v636_v8 = vsel %vm634_vm1, %v635_v57, %v633_v2  ;;  %v660_v9 = vadd.f32 %v659_v7, %v658_v1 }
  0x73   :  { %v661_v11 = vsel %vm207_vm0, %v636_v8, 0.0 }
  0x74   :  { %v662_v12 = vadd.f32 %v661_v11, %v660_v9 }
  0x76   :  { %663 = vadd.xlane.f32.xlu0 %v662_v12 }
  0xe3   :  { %v653_v13 = vpop.xlane.xlu0 %652 }
  0xe4   :  { %v655_v16 = vmul.f32 0.001953125, %v653_v13 }
  0xe6   :  { %v668_v3 = vcombine.low %v655_v16, %v655_v16 }
  0xe8   :  { %v676_v17 = vrot.slane %v668_v3, %v802_v5 }
  0xff   :  { %v664_v62 = vpop.xlane.xlu0 %663 }
 0x100   :  { %v665_v6 = vmul.f32 0.001953125, %v664_v62 }
 0x102   :  { %v669_v10 = vcombine.low %v665_v6, %v665_v6 }
 0x104   :  { %v683_v4 = vrot.slane %v669_v10, %v802_v5 }
 0x106   :  { %v684_v18 = vcombine.low %v676_v17, %v683_v4 }
 0x108   :  { %686 = vst [vmem:[#allocation5 + $0x10] sm:$0xff] %v684_v18  ;;  %687 = vst [vmem:[#allocation5 + $0x28] sm:$0xff] %v684_v18 }
 0x109   :  { %688 = vst [vmem:[#allocation5 + $0x40] sm:$0xff] %v684_v18  ;;  %689 = vst [vmem:[#allocation5 + $0x58] sm:$0xff] %v684_v18 }
 0x10a   :  { %769 = shalt.err (!%p766_p9)
}
 0x10b   :  { %s787_s15 = smov 384   ;;  %s788_s16 = smov 24  }
 0x10c   :  { %701 = dma.vmem_to_hbm [thread:$0]  %s696_s13, 1536, %s1015_s1, [#allocation4], %s787_s15, %s787_s15, %s788_s16  }
 0x10d   :  { %780 = dma.done.wait [#allocation4], 1536  }
 0x10e   :  { %781 = vsyncadd [#allocation4], 4294965760 }
 0x10f   :  { %705 = vsyncpa [#allocation3], 1 }
 0x110   :  { %706 = vsyncpa [#allocation4], 1 }

</bundles_post_ra>
